<compile_context>
chip_gen: v6e
topology: v6e:2x2x1
jax: 0.10.0
libtpu: 0.0.40
codegen_flags: <defaults>
</compile_context>

<pallas_src>
import functools

import jax
import jax.numpy as jnp
from jax.experimental import pallas as pl
from jax.experimental.pallas import tpu as pltpu

# Model hyperparameters (VL20.__init__ defaults)
NX = 36
F_CONST = 10.0
G_CONST = 10.0
ALPHA = 1.0
GAMMA = 1.0

_LANE = 128
_MAX_TB = 8192            # lane tile cap (batch axis), multiple of 128
_VMEM_LIMIT = 48 << 20    # bytes; see budget note in header


def _round_up(a, m):
    return (a + m - 1) // m * m


def _cdiv(a, m):
    return (a + m - 1) // m


def _choose_tiles(B):
    """Pick (lane_tile, grid, padded_B) for the batch axis.

    Pads B only up to a multiple of 128, forces >= 2 grid blocks once the
    padded batch reaches 256 lanes (keeps both v7x TensorCores busy), and
    derives the tile by ceil-div so padding waste stays < 128 lanes/block.
    """
    b128 = _round_up(max(int(B), 1), _LANE)
    min_blocks = 2 if b128 >= 2 * _LANE else 1
    grid = max(_cdiv(b128, _MAX_TB), min_blocks)
    tb = _round_up(_cdiv(b128, grid), _LANE)
    b_pad = grid * tb
    return tb, grid, b_pad


def _cshift(v, s):
    """Circular shift along axis 0 (the nX axis), matching torch.roll(v, s, -1)
    of the original (batch-last) layout.

    Static slices + concat over the true nX extent, so the wrap never goes
    through padding.  NOTE (review item 8): while HBM-bound these copies are
    perf-neutral; if bundle dumps show them materializing and limiting the
    lane tile, the shifted tiles below are already shared between both output
    expressions, which is the cheapest restructuring available.
    """
    n = v.shape[0]
    s = s % n
    if s == 0:
        return v
    return jnp.concatenate([v[n - s:, :], v[:n - s, :]], axis=0)


def _vl20_kernel(x_ref, o_ref, *, nX, F, G, alpha, gamma):
    # Block: (2*nX, TB), batch on the 128-lane axis, channels stacked on
    # sublanes (rows 0:nX = X, rows nX:2*nX = theta).
    xin = x_ref[...]                      # (2*nX, TB)
    X = xin[:nX, :]                       # (nX, TB)
    theta = xin[nX:, :]                   # (nX, TB)

    X_p1 = _cshift(X, 1)                  # torch.roll(X,  1, -1)
    X_m1 = _cshift(X, -1)                 # torch.roll(X, -1, -1)
    X_m2 = _cshift(X, -2)                 # torch.roll(X, -2, -1)
    th_p2 = _cshift(theta, 2)
    th_m2 = _cshift(theta, -2)

    out0 = (X_p1 - X_m2) * X_m1 - gamma * X + (F - alpha * theta)
    out1 = X_p1 * th_p2 - X_m1 * th_m2 - gamma * theta + (alpha * X + G)

    # Single full-tile, lane-dense, sublane-aligned store.
    o_ref[...] = jnp.concatenate([out0, out1], axis=0)


def vl20_forward_nxb(xt, *, F=F_CONST, G=G_CONST, alpha=ALPHA, gamma=GAMMA):
    """Kernel-facing entry point.

    xt: (2*nX, B) float32 with batch on the last (lane) axis, rows 0:nX = X
    and rows nX:2*nX = theta.  Returns the same layout.  Callers that can
    keep this layout avoid all wrapper transposes.
    """
    two_nx, B = xt.shape
    assert two_nx % 2 == 0
    nX = two_nx // 2

    tb, grid, b_pad = _choose_tiles(B)
    if b_pad != B:
        xt = jnp.pad(xt, ((0, 0), (0, b_pad - B)))

    kernel = functools.partial(_vl20_kernel, nX=nX, F=F, G=G,
                               alpha=alpha, gamma=gamma)

    # Block dims: first dim (2*nX = 72) equals the full array dim, last dim
    # (tb) is a multiple of 128 -> (8, 128) constraint satisfied, all stores
    # are full unmasked lane-dense stores.
    out = pl.pallas_call(
        kernel,
        out_shape=jax.ShapeDtypeStruct((two_nx, b_pad), xt.dtype),
        grid_spec=pltpu.PrefetchScalarGridSpec(
            num_scalar_prefetch=0,
            grid=(grid,),
            in_specs=[pl.BlockSpec((two_nx, tb), lambda i: (0, i))],
            out_specs=pl.BlockSpec((two_nx, tb), lambda i: (0, i)),
        ),
        compiler_params=pltpu.CompilerParams(
            dimension_semantics=("parallel",),
            vmem_limit_bytes=_VMEM_LIMIT),
    )(xt)

    return out[:, :B] if b_pad != B else out


def vl20_forward(x, *, F=F_CONST, G=G_CONST, alpha=ALPHA, gamma=GAMMA):
    """Pallas implementation of VL20.forward(t, x).  x: (B, 2, nX) float32."""
    B, C, nX = x.shape
    assert C == 2, "VL20 expects exactly 2 channels (X, theta)"

    # Free reshape (contiguous) + ONE transpose to the lane-dense layout.
    xt = jnp.transpose(x.reshape(B, 2 * nX))          # (2*nX, B)
    out_t = vl20_forward_nxb(xt, F=F, G=G, alpha=alpha, gamma=gamma)
    # ONE transpose back + free reshape.
    return jnp.transpose(out_t).reshape(B, 2, nX)


def vl20_reference(x, *, F=F_CONST, G=G_CONST, alpha=ALPHA, gamma=GAMMA):
    """Plain-JAX mirror of the PyTorch forward, for verification."""
    X = x[:, 0, :]
    theta = x[:, 1, :]
    out0 = (jnp.roll(X, 1, -1) - jnp.roll(X, -2, -1)) * jnp.roll(X, -1, -1)
    out0 = out0 - gamma * X + (F - alpha * theta)
    out1 = jnp.roll(X, 1, -1) * jnp.roll(theta, 2, -1) \
         - jnp.roll(X, -1, -1) * jnp.roll(theta, -2, -1)
    out1 = out1 - gamma * theta + (alpha * X + G)
    return jnp.stack([out0, out1], axis=1)


if __name__ == "__main__":
    key = jax.random.PRNGKey(0)
    t = 0.0  # unused by the dynamics (matches the PyTorch signature)

    # Small primary test (module-sized shapes).
    B = 4
    x_small = jax.random.normal(key, (B, 2, NX), dtype=jnp.float32)
    out_small = jax.block_until_ready(vl20_forward(x_small))
    ref_small = vl20_reference(x_small)
    assert out_small.shape == x_small.shape and out_small.dtype == x_small.dtype
    assert jnp.allclose(out_small, ref_small, atol=1e-5, rtol=1e-5), \
        "mismatch vs reference (B=4)"

    # Secondary check: non-multiple-of-128 batch -> lane padding + a 2-block
    # grid (padded batch 256 -> grid=(2,), tb=128), exercising the multi-core
    # path and the capped-padding tile selection.
    x_big = jax.random.normal(jax.random.PRNGKey(1), (165, 2, NX),
                              dtype=jnp.float32)
    out_big = jax.block_until_ready(vl20_forward(x_big))
    ref_big = vl20_reference(x_big)
    assert jnp.allclose(out_big, ref_big, atol=1e-5, rtol=1e-5), \
        "mismatch vs reference (padded batch, 2-block grid)"

    print("KERNEL_OK")
</pallas_src>

<mosaic_0001>
module attributes {stable_mosaic.version = 11 : i64} {
  func.func @_vl20_kernel(%arg0: i32, %arg1: memref<72x128xf32, #tpu.memory_space<vmem>>, %arg2: memref<72x128xf32, #tpu.memory_space<vmem>>) attributes {dimension_semantics = [#tpu.dimension_semantics<parallel>], iteration_bounds = array<i64: 1>, scalar_prefetch = 0 : i64, scratch_operands = 0 : i64, tpu.core_type = #tpu.core_type<tc>, window_params = [{transform_indices = @transform_0, window_bounds = array<i64: 72, 128>}, {transform_indices = @transform_1, window_bounds = array<i64: 72, 128>}]} {
    %c0 = arith.constant 0 : index
    %c0_0 = arith.constant 0 : index
    %0 = vector.load %arg1[%c0, %c0_0] : memref<72x128xf32, #tpu.memory_space<vmem>>, vector<72x128xf32>
    %1 = vector.extract_strided_slice %0 {offsets = [0, 0], sizes = [36, 128], strides = [1, 1]} : vector<72x128xf32> to vector<36x128xf32>
    %2 = vector.extract_strided_slice %0 {offsets = [36, 0], sizes = [36, 128], strides = [1, 1]} : vector<72x128xf32> to vector<36x128xf32>
    %3 = vector.extract_strided_slice %1 {offsets = [35, 0], sizes = [1, 128], strides = [1, 1]} : vector<36x128xf32> to vector<1x128xf32>
    %4 = vector.extract_strided_slice %1 {offsets = [0, 0], sizes = [35, 128], strides = [1, 1]} : vector<36x128xf32> to vector<35x128xf32>
    %5 = tpu.concatenate %3, %4 in 0 : vector<1x128xf32>, vector<35x128xf32> -> vector<36x128xf32>
    %6 = vector.extract_strided_slice %1 {offsets = [1, 0], sizes = [35, 128], strides = [1, 1]} : vector<36x128xf32> to vector<35x128xf32>
    %7 = vector.extract_strided_slice %1 {offsets = [0, 0], sizes = [1, 128], strides = [1, 1]} : vector<36x128xf32> to vector<1x128xf32>
    %8 = tpu.concatenate %6, %7 in 0 : vector<35x128xf32>, vector<1x128xf32> -> vector<36x128xf32>
    %9 = vector.extract_strided_slice %1 {offsets = [2, 0], sizes = [34, 128], strides = [1, 1]} : vector<36x128xf32> to vector<34x128xf32>
    %10 = vector.extract_strided_slice %1 {offsets = [0, 0], sizes = [2, 128], strides = [1, 1]} : vector<36x128xf32> to vector<2x128xf32>
    %11 = tpu.concatenate %9, %10 in 0 : vector<34x128xf32>, vector<2x128xf32> -> vector<36x128xf32>
    %12 = vector.extract_strided_slice %2 {offsets = [34, 0], sizes = [2, 128], strides = [1, 1]} : vector<36x128xf32> to vector<2x128xf32>
    %13 = vector.extract_strided_slice %2 {offsets = [0, 0], sizes = [34, 128], strides = [1, 1]} : vector<36x128xf32> to vector<34x128xf32>
    %14 = tpu.concatenate %12, %13 in 0 : vector<2x128xf32>, vector<34x128xf32> -> vector<36x128xf32>
    %15 = vector.extract_strided_slice %2 {offsets = [2, 0], sizes = [34, 128], strides = [1, 1]} : vector<36x128xf32> to vector<34x128xf32>
    %16 = vector.extract_strided_slice %2 {offsets = [0, 0], sizes = [2, 128], strides = [1, 1]} : vector<36x128xf32> to vector<2x128xf32>
    %17 = tpu.concatenate %15, %16 in 0 : vector<34x128xf32>, vector<2x128xf32> -> vector<36x128xf32>
    %18 = arith.subf %5, %11 : vector<36x128xf32>
    %19 = arith.mulf %18, %8 : vector<36x128xf32>
    %cst = arith.constant 1.000000e+00 : f32
    %20 = vector.broadcast %cst : f32 to vector<36x128xf32>
    %21 = arith.mulf %20, %1 : vector<36x128xf32>
    %22 = arith.subf %19, %21 : vector<36x128xf32>
    %cst_1 = arith.constant 1.000000e+00 : f32
    %23 = vector.broadcast %cst_1 : f32 to vector<36x128xf32>
    %24 = arith.mulf %23, %2 : vector<36x128xf32>
    %cst_2 = arith.constant 1.000000e+01 : f32
    %25 = vector.broadcast %cst_2 : f32 to vector<36x128xf32>
    %26 = arith.subf %25, %24 : vector<36x128xf32>
    %27 = arith.addf %22, %26 : vector<36x128xf32>
    %28 = arith.mulf %5, %14 : vector<36x128xf32>
    %29 = arith.mulf %8, %17 : vector<36x128xf32>
    %30 = arith.subf %28, %29 : vector<36x128xf32>
    %cst_3 = arith.constant 1.000000e+00 : f32
    %31 = vector.broadcast %cst_3 : f32 to vector<36x128xf32>
    %32 = arith.mulf %31, %2 : vector<36x128xf32>
    %33 = arith.subf %30, %32 : vector<36x128xf32>
    %cst_4 = arith.constant 1.000000e+00 : f32
    %34 = vector.broadcast %cst_4 : f32 to vector<36x128xf32>
    %35 = arith.mulf %34, %1 : vector<36x128xf32>
    %cst_5 = arith.constant 1.000000e+01 : f32
    %36 = vector.broadcast %cst_5 : f32 to vector<36x128xf32>
    %37 = arith.addf %35, %36 : vector<36x128xf32>
    %38 = arith.addf %33, %37 : vector<36x128xf32>
    %39 = tpu.concatenate %27, %38 in 0 : vector<36x128xf32>, vector<36x128xf32> -> vector<72x128xf32>
    %c0_6 = arith.constant 0 : index
    %c0_7 = arith.constant 0 : index
    %40 = vector.load %arg2[%c0_6, %c0_7] : memref<72x128xf32, #tpu.memory_space<vmem>>, vector<72x128xf32>
    tpu.vector_store %arg2[%c0_6, %c0_7], %39 {strides = array<i32>} : memref<72x128xf32, #tpu.memory_space<vmem>>, vector<72x128xf32>,
    return
  }
  func.func @transform_0(%arg0: i32) -> (i32, i32) {
    %c0_i32 = arith.constant 0 : i32
    %c0_i32_0 = arith.constant 0 : i32
    return %c0_i32, %arg0 : i32, i32
  }
  func.func @transform_1(%arg0: i32) -> (i32, i32) {
    %c0_i32 = arith.constant 0 : i32
    %c0_i32_0 = arith.constant 0 : i32
    return %c0_i32, %arg0 : i32, i32
  }
}

</mosaic_0001>

<bundles_post_ra>
// kernel: tpu_custom_call.1
= control target key start
LH: loop header
LB: loop body
LE: loop exit
PB: predicated region body
PF: predicated region fallthrough
CT: control target
= control target key end

     0   :  { %6 = vsyncpa [#allocation3], 0  ;;  %s461_s0 = inlined_call_operand.hbm [shape: f32[72,128], index: 0, kind: input, shape index: {}]   ;;  %s462_s1 = inlined_call_operand.hbm [shape: f32[72,128], index: 1, kind: output, shape index: {}]  }
   0x1   :  { %7 = vsyncpa [#allocation4], 0  ;;  %s309_s6 = smov [#allocation2]  }
   0x2   :  { %s13_s7 = sshll.u32 %s309_s6, 4  ;;  %s14_s7 = int_to_ptr.vmem [resolvable:$true] %s13_s7 }
   0x3   :  { %s273_s8 = scalar_lea.vmem %s14_s7, 1152  ;;  %p278_p1 = scmp.lt.s32.totalorder %s14_s7, %s14_s7 }
   0x4   :  { %p274_p0 = scmp.ne.s32.totalorder %s14_s7, %s273_s8  ;;  %p279_p2 = scmp.lt.s32.totalorder %s273_s8, %s273_s8 }
   0x6   :  { %p280_p3 = por %p279_p2, %p278_p1 }
   0x8   :  { %p281_p4 = pnand %p280_p3, %p274_p0 }
   0xa   :  { %284 = shalt.err (!%p281_p4)
}
   0xb   :  { %s310_s9 = smov 128   ;;  %s311_s10 = smov 8  }
   0xc   :  { %19 = dma.hbm_to_vmem [thread:$0]  %s461_s0, 1152, %s14_s7, [#allocation3], %s310_s9, %s310_s9, %s311_s10  }
   0xd   :  { %305 = dma.done.wait [#allocation3], 1152  }
   0xe   :  { %306 = vsyncadd [#allocation3], 4294966144  ;;  %vm39_vm0 = vcmask 1040384   ;;  %vm55_vm1 = vcmask 1046528   ;;  %v329_v0 = vld [vmem:[#allocation2] sm:$0xff]  ;;  %v331_v1 = vld [vmem:[#allocation2 + $0x8] sm:$0xff] }
   0xf   :  { %v333_v2 = vld [vmem:[#allocation2 + $0x20] sm:$0xff]  ;;  %vm74_vm2 = vcmask 1045504   ;;  %vm91_vm3 = vcmask 1041408   ;;  %vm151_vm4 = vcmask 1043456   ;;  %v335_v3 = vld [vmem:[#allocation2 + $0x28] sm:$0xff]  ;;  %v40_v6 = vrot.slane %v329_v0, 7 }
  0x10   :  { %v337_v4 = vld [vmem:[#allocation2 + $0x40] sm:$0xff]  ;;  %v33_v5 = vrot.slane %v333_v2, 3  ;;  %v56_v7 = vrot.slane %v329_v0, 1  ;;  %v57_v8 = vrot.slane %v331_v1, 1  ;;  %v75_v9 = vrot.slane %v329_v0, 2  ;;  %v351_v13 = vld [vmem:[#allocation2 + $0x10] sm:$0xff] }
  0x11   :  { %v76_v10 = vrot.slane %v331_v1, 2  ;;  %v346_v11 = vrot.slane %v333_v2, 2  ;;  %v349_v12 = vrot.slane %v337_v4, 6  ;;  %v99_v16 = vrot.slane %v335_v3, 2  ;;  %v363_v24 = vld [vmem:[#allocation2 + $0x30] sm:$0xff]  ;;  %v375_v35 = vld [vmem:[#allocation2 + $0x18] sm:$0xff] }
  0x12   :  { %v54_v14 = vsel %vm39_vm0, %v33_v5, %v40_v6  ;;  %v58_v15 = vsel %vm55_vm1, %v56_v7, %v57_v8  ;;  %v113_v17 = vrot.slane %v333_v2, 6  ;;  %v114_v19 = vrot.slane %v335_v3, 6  ;;  %v387_v46 = vld [vmem:[#allocation2 + $0x38] sm:$0xff]  ;;  %s312_s0 = smov [#allocation5]  }
  0x13   :  { %v77_v18 = vsel %vm74_vm2, %v75_v9, %v76_v10  ;;  %v141_v20 = vsub.f32 10.0, %v333_v2  ;;  %v142_v21 = vsub.f32 10.0, %v335_v3  ;;  %v100_v22 = vsel %vm74_vm2, %v346_v11, %v99_v16  ;;  %s249_s13 = sshll.u32 %s312_s0, 4  ;;  %s250_s13 = int_to_ptr.vmem [resolvable:$true] %s249_s13 }
  0x14   :  { %v126_v23 = vsub.f32 %v54_v14, %v77_v18  ;;  %v41_v25 = vrot.slane %v331_v1, 7  ;;  %v59_v26 = vrot.slane %v351_v13, 1  ;;  %v112_v27 = vsel %vm91_vm3, %v349_v12, %v100_v22  ;;  %s285_s14 = scalar_lea.vmem %s250_s13, 1152  ;;  %p290_p6 = scmp.lt.s32.totalorder %s250_s13, %s250_s13 }
  0x15   :  { %v115_v28 = vsel %vm91_vm3, %v113_v17, %v114_v19  ;;  %v152_v29 = vrot.slane %v141_v20, 4  ;;  %v153_v30 = vrot.slane %v142_v21, 4  ;;  %v370_v32 = vmul.f32 %v112_v27, %v54_v14  ;;  %p286_p5 = scmp.ne.s32.totalorder %s250_s13, %s285_s14  ;;  %p291_p7 = scmp.lt.s32.totalorder %s285_s14, %s285_s14 }
  0x16   :  { %v131_v31 = vmul.f32 %v126_v23, %v58_v15  ;;  %v372_v33 = vmul.f32 %v115_v28, %v58_v15  ;;  %v42_v34 = vsel %vm39_vm0, %v40_v6, %v41_v25  ;;  %v60_v37 = vsel %vm55_vm1, %v57_v8, %v59_v26 }
  0x17   :  { %v154_v36 = vsel %vm151_vm4, %v152_v29, %v153_v30  ;;  %v78_v38 = vrot.slane %v351_v13, 2  ;;  %v101_v39 = vrot.slane %v363_v24, 2  ;;  %v116_v41 = vrot.slane %v363_v24, 6  ;;  %p292_p8 = por %p291_p7, %p290_p6 }
  0x18   :  { %v136_v40 = vsub.f32 %v131_v31, %v329_v0  ;;  %v143_v42 = vsub.f32 10.0, %v363_v24  ;;  %v43_v43 = vrot.slane %v351_v13, 7  ;;  %v61_v47 = vrot.slane %v375_v35, 1 }
  0x19   :  { %v79_v44 = vsel %vm74_vm2, %v76_v10, %v78_v38  ;;  %v102_v45 = vsel %vm74_vm2, %v99_v16, %v101_v39  ;;  %v80_v48 = vrot.slane %v375_v35, 2  ;;  %v117_v50 = vsel %vm91_vm3, %v114_v19, %v116_v41  ;;  %p293_p9 = pnand %p292_p8, %p286_p5 }
  0x1a   :  { %v166_v49 = vadd.f32 %v154_v36, %v136_v40  ;;  %v127_v51 = vsub.f32 %v42_v34, %v79_v44  ;;  %v155_v52 = vrot.slane %v143_v42, 4  ;;  %vm72_vm5 = vcmask 1042432  }
  0x1b   :  { %v392_v53 = vmul.f32 %v102_v45, %v42_v34  ;;  %v394_v54 = vmul.f32 %v117_v50, %v60_v37  ;;  %v44_v55 = vsel %vm39_vm0, %v41_v25, %v43_v43  ;;  %v62_v56 = vsel %vm55_vm1, %v59_v26, %v61_v47 }
  0x1c   :  { %235 = vst [vmem:[#allocation5] sm:$0xff] %v166_v49  ;;  %v132_v57 = vmul.f32 %v127_v51, %v60_v37  ;;  %v156_v58 = vsel %vm151_vm4, %v153_v30, %v155_v52  ;;  %v81_v59 = vsel %vm74_vm2, %v78_v38, %v80_v48  ;;  %v103_v60 = vrot.slane %v387_v46, 2 }
  0x1d   :  { %v118_v61 = vrot.slane %v387_v46, 6  ;;  %v128_v62 = vsub.f32 %v44_v55, %v81_v59  ;;  %v144_v63 = vsub.f32 10.0, %v387_v46  ;;  %v45_v5 = vrot.slane %v375_v35, 7 }
  0x1e   :  { %v137_v6 = vsub.f32 %v132_v57, %v331_v1  ;;  %v104_v7 = vsel %vm74_vm2, %v101_v39, %v103_v60  ;;  %v63_v8 = vrot.slane %v333_v2, 1  ;;  %v83_v9 = vsel %vm74_vm2, %v80_v48, %v346_v11 }
  0x1f   :  { %v119_v10 = vsel %vm91_vm3, %v116_v41, %v118_v61  ;;  %v133_v14 = vmul.f32 %v128_v62, %v62_v56  ;;  %v157_v15 = vrot.slane %v144_v63, 4  ;;  %v173_v16 = vmul.f32 %v104_v7, %v44_v55 }
  0x20   :  { %v167_v17 = vadd.f32 %v156_v58, %v137_v6  ;;  %v178_v18 = vmul.f32 %v119_v10, %v62_v56  ;;  %v46_v19 = vsel %vm39_vm0, %v43_v43, %v45_v5  ;;  %v64_v20 = vsel %vm55_vm1, %v61_v47, %v63_v8 }
  0x21   :  { %v138_v21 = vsub.f32 %v133_v14, %v351_v13  ;;  %v158_v22 = vsel %vm151_vm4, %v155_v52, %v157_v15  ;;  %v105_v23 = vrot.slane %v337_v4, 2  ;;  %v120_v25 = vsel %vm91_vm3, %v118_v61, %v349_v12 }
  0x22   :  { %236 = vst [vmem:[#allocation5 + $0x8] sm:$0xff] %v167_v17  ;;  %v129_v26 = vsub.f32 %v46_v19, %v83_v9  ;;  %v145_v27 = vsub.f32 10.0, %v337_v4  ;;  %v179_v28 = vmul.f32 %v120_v25, %v64_v20  ;;  %v47_v29 = vrot.slane %v333_v2, 7 }
  0x23   :  { %v168_v30 = vadd.f32 %v158_v22, %v138_v21  ;;  %v106_v31 = vsel %vm74_vm2, %v103_v60, %v105_v23  ;;  %v70_v34 = vrot.slane %v329_v0, 5  ;;  %v89_v36 = vrot.slane %v329_v0, 6 }
  0x24   :  { %v134_v37 = vmul.f32 %v129_v26, %v64_v20  ;;  %v159_v38 = vrot.slane %v145_v27, 4  ;;  %v174_v39 = vmul.f32 %v106_v31, %v46_v19  ;;  %v48_v40 = vsel %vm39_vm0, %v45_v5, %v47_v29 }
  0x25   :  { %237 = vst [vmem:[#allocation5 + $0x10] sm:$0xff] %v168_v30  ;;  %v73_v41 = vsel %vm72_vm5, %v63_v8, %v70_v34  ;;  %v92_v42 = vsel %vm91_vm3, %v346_v11, %v89_v36  ;;  %v125_v43 = vsel %vm91_vm3, %v349_v12, %v346_v11  ;;  %v181_v44 = vsub.f32 %v370_v32, %v372_v33 }
  0x26   :  { %v139_v45 = vsub.f32 %v134_v37, %v375_v35  ;;  %v160_v47 = vsel %vm151_vm4, %v157_v15, %v159_v38  ;;  %v130_v48 = vsub.f32 %v48_v40, %v92_v42  ;;  %v180_v49 = vmul.f32 %v125_v43, %v73_v41 }
  0x27   :  { %v186_v50 = vrot.slane %v333_v2, 4  ;;  %v187_v51 = vrot.slane %v335_v3, 4  ;;  %v205_v52 = vadd.f32 10.0, %v329_v0  ;;  %v182_v55 = vsub.f32 %v392_v53, %v394_v54 }
  0x28   :  { %v169_v56 = vadd.f32 %v160_v47, %v139_v45  ;;  %v135_v11 = vmul.f32 %v130_v48, %v73_v41  ;;  %v189_v12 = vrot.slane %v363_v24, 4  ;;  %v206_v32 = vadd.f32 10.0, %v331_v1 }
  0x29   :  { %v188_v33 = vsel %vm151_vm4, %v186_v50, %v187_v51  ;;  %v183_v57 = vsub.f32 %v173_v16, %v178_v18  ;;  %v191_v58 = vrot.slane %v387_v46, 4  ;;  %v207_v59 = vadd.f32 10.0, %v351_v13 }
  0x2a   :  { %238 = vst [vmem:[#allocation5 + $0x18] sm:$0xff] %v169_v56  ;;  %v140_v3 = vsub.f32 %v135_v11, %v333_v2  ;;  %v200_v0 = vsub.f32 %v181_v44, %v188_v33  ;;  %v190_v60 = vsel %vm151_vm4, %v187_v51, %v189_v12  ;;  %v184_v53 = vsub.f32 %v174_v39, %v179_v28 }
  0x2b   :  { %v201_v54 = vsub.f32 %v182_v55, %v190_v60  ;;  %v192_v61 = vsel %vm151_vm4, %v189_v12, %v191_v58  ;;  %v193_v24 = vrot.slane %v337_v4, 4  ;;  %v208_v1 = vadd.f32 10.0, %v375_v35 }
  0x2c   :  { %v170_v62 = vadd.f32 %v159_v38, %v140_v3  ;;  %v210_v63 = vadd.f32 %v205_v52, %v200_v0  ;;  %v202_v5 = vsub.f32 %v183_v57, %v192_v61  ;;  %v175_v46 = vmul.f32 %v105_v23, %v48_v40 }
  0x2d   :  { %v211_v6 = vadd.f32 %v206_v32, %v201_v54  ;;  %v194_v13 = vsel %vm151_vm4, %v191_v58, %v193_v24  ;;  %v209_v7 = vadd.f32 10.0, %v333_v2 }
  0x2e   :  { %v220_v8 = vrot.slane %v210_v63, 4  ;;  %v212_v9 = vadd.f32 %v207_v59, %v202_v5  ;;  %v203_v10 = vsub.f32 %v184_v53, %v194_v13  ;;  %v185_v14 = vsub.f32 %v175_v46, %v180_v49 }
  0x2f   :  { %v221_v15 = vrot.slane %v211_v6, 4 }
  0x30   :  { %v234_v16 = vsel %vm151_vm4, %v170_v62, %v220_v8  ;;  %v223_v17 = vrot.slane %v212_v9, 4  ;;  %v213_v4 = vadd.f32 %v208_v1, %v203_v10  ;;  %v204_v18 = vsub.f32 %v185_v14, %v193_v24 }
  0x31   :  { %239 = vst [vmem:[#allocation5 + $0x20] sm:$0xff] %v234_v16  ;;  %v222_v35 = vsel %vm151_vm4, %v220_v8, %v221_v15 }
  0x32   :  { %240 = vst [vmem:[#allocation5 + $0x28] sm:$0xff] %v222_v35  ;;  %v224_v19 = vsel %vm151_vm4, %v221_v15, %v223_v17  ;;  %v225_v20 = vrot.slane %v213_v4, 4  ;;  %v214_v21 = vadd.f32 %v209_v7, %v204_v18 }
  0x33   :  { %241 = vst [vmem:[#allocation5 + $0x30] sm:$0xff] %v224_v19 }
  0x34   :  { %v226_v2 = vsel %vm151_vm4, %v223_v17, %v225_v20  ;;  %v227_v22 = vrot.slane %v214_v21, 4 }
  0x35   :  { %242 = vst [vmem:[#allocation5 + $0x38] sm:$0xff] %v226_v2 }
  0x36   :  { %v228_v23 = vsel %vm151_vm4, %v225_v20, %v227_v22 }
  0x37   :  { %243 = vst [vmem:[#allocation5 + $0x40] sm:$0xff] %v228_v23 }
  0x38   :  { %296 = shalt.err (!%p293_p9)
}
  0x39   :  { %255 = dma.vmem_to_hbm [thread:$0]  %s250_s13, 1152, %s462_s1, [#allocation4], %s310_s9, %s310_s9, %s311_s10  }
  0x3a   :  { %307 = dma.done.wait [#allocation4], 1152  }
  0x3b   :  { %308 = vsyncadd [#allocation4], 4294966144 }
  0x3c   :  { %259 = vsyncpa [#allocation3], 1 }
  0x3d   :  { %260 = vsyncpa [#allocation4], 1 }

</bundles_post_ra>
